<compile_context>
chip_gen: v7x
topology: tpu7x:2x2x1
jax: 0.10.0
libtpu: 0.0.40
codegen_flags: <defaults>
</compile_context>

<pallas_src>
import jax
import jax.numpy as jnp
from jax.experimental import pallas as pl
from jax.experimental.pallas import tpu as pltpu


# ---------------------------------------------------------------------------
# Small-channel (VPU) kernel: dense (sublane, lane) spatial layout.
#   x block: (Nb, Cin,  tile_s, 128)   o block: (Nb, Cout, tile_s, 128)
#   weights/bias: SMEM scalars.
# ---------------------------------------------------------------------------
def _make_vpu_kernel(cin, cout, nb, tile_s, chunk_s):
    n_full = tile_s // chunk_s
    rem = tile_s - n_full * chunk_s

    def kernel(w_ref, b_ref, x_ref, o_ref):
        # Hoist all scalar weight/bias reads out of the loops (sreg-resident).
        wk = [[w_ref[co, ci] for ci in range(cin)] for co in range(cout)]
        bk = [b_ref[co] for co in range(cout)]

        def do_chunk(b, s, size):
            # Load Cin dense (size, 128) planes once, reuse for every Cout.
            xs = [x_ref[b, ci, pl.ds(s, size), :].astype(jnp.float32)
                  for ci in range(cin)]
            for co in range(cout):
                acc = xs[0] * wk[co][0]
                for ci in range(1, cin):
                    acc = acc + xs[ci] * wk[co][ci]
                o_ref[b, co, pl.ds(s, size), :] = (acc + bk[co]).astype(o_ref.dtype)

        def per_image(b):
            if n_full > 0:
                def chunk_body(c, carry):
                    do_chunk(b, pl.multiple_of(c * chunk_s, chunk_s), chunk_s)
                    return carry
                jax.lax.fori_loop(0, n_full, chunk_body, 0,
                                  unroll=(n_full <= 8))
            if rem > 0:
                do_chunk(b, n_full * chunk_s, rem)

        if nb <= 8:
            for b in range(nb):
                per_image(b)
        else:
            @pl.loop(0, nb)
            def _(b):
                per_image(b)

    return kernel


# ---------------------------------------------------------------------------
# Large-channel (MXU) kernel: per-image (Cout,Cin) @ (Cin,tile_hw) matmul.
# ---------------------------------------------------------------------------
def _make_mxu_kernel(nb):
    def kernel(w_ref, b_ref, x_ref, o_ref):
        # w_ref: VMEM (Cout, Cin) in compute dtype; b_ref: VMEM (Cout, 1) f32
        # x_ref: VMEM (Nb, Cin, tile_hw);  o_ref: VMEM (Nb, Cout, tile_hw)
        def per_image(b):
            acc = jnp.dot(w_ref[...], x_ref[b],
                          preferred_element_type=jnp.float32)
            o_ref[b] = (acc + b_ref[...]).astype(o_ref.dtype)

        if nb <= 8:
            for b in range(nb):
                per_image(b)
        else:
            @pl.loop(0, nb)
            def _(b):
                per_image(b)

    return kernel


# ---------------------------------------------------------------------------
# Wrapper
# ---------------------------------------------------------------------------
def final_conv(x, weight, bias, *,
               block_vmem_bytes=16 * 1024 * 1024,   # double-buffered x+y blocks
               target_step_bytes=4 * 1024 * 1024,   # ~per grid step HBM traffic
               min_grid_steps=2):                   # keep both v7x TCs busy
    """1x1 Conv2d forward (matches nn.Conv2d(Cin, Cout, kernel_size=1)).

    x:      (N, Cin, H, W)    NCHW, matching PyTorch
    weight: (Cout, Cin, 1, 1)
    bias:   (Cout,)
    returns (N, Cout, H, W)
    """
    N, Cin, H, W = x.shape
    Cout = weight.shape[0]
    HW = H * W
    itemsize = jnp.dtype(x.dtype).itemsize

    w_mat = weight.reshape(Cout, Cin)
    b_vec = bias.reshape(Cout).astype(jnp.float32)

    cost = pl.CostEstimate(
        flops=2 * N * HW * Cin * Cout,
        transcendentals=0,
        bytes_accessed=itemsize * N * HW * (Cin + Cout) + 4 * Cout * (Cin + 1),
    )
    cparams = pltpu.CompilerParams(
        dimension_semantics=("parallel", "parallel"),
        vmem_limit_bytes=32 * 1024 * 1024,
    )

    # Small-channel path needs sublane-dense layout => HW % 128 == 0.
    use_vpu = (Cin <= 8 and Cout <= 8 and Cin * Cout <= 64 and HW % 128 == 0)

    if use_vpu:
        # -------- dense (Nb, Cin, S, 128) layout, VPU FMAs -----------------
        S = HW // 128
        x_in = x.reshape(N, Cin, S, 128)              # free reshape (contiguous)

        row_bytes = 128 * (Cin + Cout) * itemsize     # 1 sublane-row of in+out
        budget_rows = max(8, block_vmem_bytes // (2 * row_bytes))
        target_rows = max(8, target_step_bytes // row_bytes)

        if S <= budget_rows:
            tile_s = S
            nb = max(1, min(N, budget_rows // S, pl.cdiv(target_rows, S)))
        else:
            nb = 1
            tile_s = max(8, (min(budget_rows, target_rows) // 8) * 8)

        # Guarantee >= min_grid_steps grid steps when possible (v7x: 2 TCs).
        if pl.cdiv(N, nb) * pl.cdiv(S, tile_s) < min_grid_steps:
            if N >= 2:
                nb = pl.cdiv(N, 2)
            elif tile_s == S and S >= 16:
                tile_s = max(8, (pl.cdiv(S, 2) // 8) * 8)

        # Spatial chunk inside the kernel: keep ~(Cin+Cout)*chunk_s/8 <= 32 vregs.
        chunk_s = max(8, ((256 // (Cin + Cout)) // 8) * 8)
        chunk_s = min(chunk_s, tile_s)

        kernel = _make_vpu_kernel(Cin, Cout, nb, tile_s, chunk_s)
        grid = (pl.cdiv(N, nb), pl.cdiv(S, tile_s))
        in_specs = [
            pl.BlockSpec(memory_space=pltpu.MemorySpace.SMEM),   # weights
            pl.BlockSpec(memory_space=pltpu.MemorySpace.SMEM),   # bias
            pl.BlockSpec((nb, Cin, tile_s, 128), lambda n, t: (n, 0, t, 0)),
        ]
        out_specs = pl.BlockSpec((nb, Cout, tile_s, 128),
                                 lambda n, t: (n, 0, t, 0))
        out_shape = jax.ShapeDtypeStruct((N, Cout, S, 128), x.dtype)
        args = (w_mat.astype(jnp.float32), b_vec, x_in)
    else:
        # -------- (Nb, C, tile_hw) lane layout, MXU matmul ------------------
        x_in = x.reshape(N, Cin, HW)                  # free reshape (contiguous)

        px_bytes = (Cin + Cout) * itemsize
        budget_px = max(128, block_vmem_bytes // (2 * px_bytes))
        target_px = max(128, target_step_bytes // px_bytes)

        if HW <= budget_px:
            tile_hw = HW
            nb = max(1, min(N, budget_px // HW, pl.cdiv(target_px, HW)))
        else:
            nb = 1
            tile_hw = max(128, (min(budget_px, target_px) // 128) * 128)

        if pl.cdiv(N, nb) * pl.cdiv(HW, tile_hw) < min_grid_steps:
            if N >= 2:
                nb = pl.cdiv(N, 2)
            elif tile_hw == HW and HW >= 256:
                tile_hw = max(128, ((HW // 2) // 128) * 128)

        # bf16-native MXU on v6e/v7x: keep weights in the activation dtype,
        # accumulate in f32 via preferred_element_type.
        compute_dtype = (x.dtype if jnp.issubdtype(x.dtype, jnp.floating)
                         else jnp.float32)

        kernel = _make_mxu_kernel(nb)
        grid = (pl.cdiv(N, nb), pl.cdiv(HW, tile_hw))
        in_specs = [
            pl.BlockSpec((Cout, Cin), lambda n, t: (0, 0)),      # resident W
            pl.BlockSpec((Cout, 1), lambda n, t: (0, 0)),        # resident bias
            pl.BlockSpec((nb, Cin, tile_hw), lambda n, t: (n, 0, t)),
        ]
        out_specs = pl.BlockSpec((nb, Cout, tile_hw), lambda n, t: (n, 0, t))
        out_shape = jax.ShapeDtypeStruct((N, Cout, HW), x.dtype)
        args = (w_mat.astype(compute_dtype), b_vec.reshape(Cout, 1), x_in)

    out = pl.pallas_call(
        kernel,
        out_shape=out_shape,
        grid=grid,
        in_specs=in_specs,
        out_specs=out_specs,
        compiler_params=cparams,
        cost_estimate=cost,
    )(*args)

    return out.reshape(N, Cout, H, W)


# ---------------------------------------------------------------------------
# Reference + self-test
# ---------------------------------------------------------------------------
def _conv1x1_ref(x, weight, bias):
    """Exact-f32 elementwise reference (no matmul, so no MXU rounding)."""
    Cout, Cin = weight.shape[0], weight.shape[1]
    w = weight.reshape(Cout, Cin)
    y = jnp.sum(w[None, :, :, None, None] * x[:, None, :, :, :], axis=2)
    return y + bias.reshape(1, -1, 1, 1)


if __name__ == "__main__":
    key = jax.random.PRNGKey(0)
    keys = jax.random.split(key, 9)

    # --- 1) Small-channel FinalConv (dense VPU path) ------------------------
    N, Cin, H, W, Cout = 2, 4, 16, 16, 3
    bound = 1.0 / (Cin ** 0.5)
    w1 = jax.random.uniform(keys[0], (Cout, Cin, 1, 1), jnp.float32, -bound, bound)
    b1 = jax.random.uniform(keys[1], (Cout,), jnp.float32, -bound, bound)
    x1 = jax.random.normal(keys[2], (N, Cin, H, W), jnp.float32)

    y1 = jax.block_until_ready(final_conv(x1, w1, b1))
    assert y1.shape == (N, Cout, H, W)
    assert jnp.allclose(y1, _conv1x1_ref(x1, w1, b1), atol=1e-5, rtol=1e-5)

    # --- 2) Larger-channel case (MXU path) ----------------------------------
    N2, C2i, H2, W2, C2o = 2, 128, 16, 16, 16
    bound2 = 1.0 / (C2i ** 0.5)
    w2 = jax.random.uniform(keys[3], (C2o, C2i, 1, 1), jnp.float32, -bound2, bound2)
    b2 = jax.random.uniform(keys[4], (C2o,), jnp.float32, -bound2, bound2)
    x2 = jax.random.normal(keys[5], (N2, C2i, H2, W2), jnp.float32)

    y2 = jax.block_until_ready(final_conv(x2, w2, b2))
    assert y2.shape == (N2, C2o, H2, W2)
    # Looser tolerance: MXU f32 matmul rounding vs exact elementwise sum.
    assert jnp.allclose(y2, _conv1x1_ref(x2, w2, b2), atol=1e-2, rtol=1e-2)

    # --- 3) Batch-blocked VPU path with a ragged last batch block -----------
    N3, C3i, H3, W3, C3o = 3, 8, 32, 32, 4
    bound3 = 1.0 / (C3i ** 0.5)
    w3 = jax.random.uniform(keys[6], (C3o, C3i, 1, 1), jnp.float32, -bound3, bound3)
    b3 = jax.random.uniform(keys[7], (C3o,), jnp.float32, -bound3, bound3)
    x3 = jax.random.normal(keys[8], (N3, C3i, H3, W3), jnp.float32)

    y3 = jax.block_until_ready(final_conv(x3, w3, b3))
    assert y3.shape == (N3, C3o, H3, W3)
    assert jnp.allclose(y3, _conv1x1_ref(x3, w3, b3), atol=1e-5, rtol=1e-5)

    print("KERNEL_OK")
</pallas_src>

<mosaic_0001>
module attributes {stable_mosaic.version = 11 : i64} {
  func.func @kernel(%arg0: i32, %arg1: i32, %arg2: memref<3x4xf32, #tpu.memory_space<smem>>, %arg3: memref<3xf32, #tpu.memory_space<smem>>, %arg4: memref<1x4x2x128xf32, #tpu.memory_space<vmem>>, %arg5: memref<1x3x2x128xf32, #tpu.memory_space<vmem>>) attributes {dimension_semantics = [#tpu.dimension_semantics<parallel>, #tpu.dimension_semantics<parallel>], iteration_bounds = array<i64: 2, 1>, scalar_prefetch = 0 : i64, scratch_operands = 0 : i64, tpu.core_type = #tpu.core_type<tc>, window_params = [{transform_indices = @transform_0, window_bounds = array<i64: 3, 4>}, {transform_indices = @transform_1, window_bounds = array<i64: 3>}, {transform_indices = @transform_2, window_bounds = array<i64: 1, 4, 2, 128>}, {transform_indices = @transform_3, window_bounds = array<i64: 1, 3, 2, 128>}]} {
    %c0 = arith.constant 0 : index
    %c0_0 = arith.constant 0 : index
    %0 = memref.load %arg2[%c0, %c0_0] : memref<3x4xf32, #tpu.memory_space<smem>>
    %c0_1 = arith.constant 0 : index
    %c1 = arith.constant 1 : index
    %1 = memref.load %arg2[%c0_1, %c1] : memref<3x4xf32, #tpu.memory_space<smem>>
    %c0_2 = arith.constant 0 : index
    %c2 = arith.constant 2 : index
    %2 = memref.load %arg2[%c0_2, %c2] : memref<3x4xf32, #tpu.memory_space<smem>>
    %c0_3 = arith.constant 0 : index
    %c3 = arith.constant 3 : index
    %3 = memref.load %arg2[%c0_3, %c3] : memref<3x4xf32, #tpu.memory_space<smem>>
    %c1_4 = arith.constant 1 : index
    %c0_5 = arith.constant 0 : index
    %4 = memref.load %arg2[%c1_4, %c0_5] : memref<3x4xf32, #tpu.memory_space<smem>>
    %c1_6 = arith.constant 1 : index
    %c1_7 = arith.constant 1 : index
    %5 = memref.load %arg2[%c1_6, %c1_7] : memref<3x4xf32, #tpu.memory_space<smem>>
    %c1_8 = arith.constant 1 : index
    %c2_9 = arith.constant 2 : index
    %6 = memref.load %arg2[%c1_8, %c2_9] : memref<3x4xf32, #tpu.memory_space<smem>>
    %c1_10 = arith.constant 1 : index
    %c3_11 = arith.constant 3 : index
    %7 = memref.load %arg2[%c1_10, %c3_11] : memref<3x4xf32, #tpu.memory_space<smem>>
    %c2_12 = arith.constant 2 : index
    %c0_13 = arith.constant 0 : index
    %8 = memref.load %arg2[%c2_12, %c0_13] : memref<3x4xf32, #tpu.memory_space<smem>>
    %c2_14 = arith.constant 2 : index
    %c1_15 = arith.constant 1 : index
    %9 = memref.load %arg2[%c2_14, %c1_15] : memref<3x4xf32, #tpu.memory_space<smem>>
    %c2_16 = arith.constant 2 : index
    %c2_17 = arith.constant 2 : index
    %10 = memref.load %arg2[%c2_16, %c2_17] : memref<3x4xf32, #tpu.memory_space<smem>>
    %c2_18 = arith.constant 2 : index
    %c3_19 = arith.constant 3 : index
    %11 = memref.load %arg2[%c2_18, %c3_19] : memref<3x4xf32, #tpu.memory_space<smem>>
    %c0_20 = arith.constant 0 : index
    %12 = memref.load %arg3[%c0_20] : memref<3xf32, #tpu.memory_space<smem>>
    %c1_21 = arith.constant 1 : index
    %13 = memref.load %arg3[%c1_21] : memref<3xf32, #tpu.memory_space<smem>>
    %c2_22 = arith.constant 2 : index
    %14 = memref.load %arg3[%c2_22] : memref<3xf32, #tpu.memory_space<smem>>
    %c0_i32 = arith.constant 0 : i32
    %c2_i32 = arith.constant 2 : i32
    %15 = arith.muli %c0_i32, %c2_i32 : i32
    %16 = tpu.assume_multiple %15, 2 : i32
    %c0_23 = arith.constant 0 : index
    %c0_24 = arith.constant 0 : index
    %17 = arith.index_cast %16 : i32 to index
    %c0_25 = arith.constant 0 : index
    %18 = vector.load %arg4[%c0_23, %c0_24, %17, %c0_25] : memref<1x4x2x128xf32, #tpu.memory_space<vmem>>, vector<1x1x2x128xf32>
    %19 = vector.shape_cast %18 : vector<1x1x2x128xf32> to vector<2x128xf32>
    %c0_26 = arith.constant 0 : index
    %c1_27 = arith.constant 1 : index
    %20 = arith.index_cast %16 : i32 to index
    %c0_28 = arith.constant 0 : index
    %21 = vector.load %arg4[%c0_26, %c1_27, %20, %c0_28] : memref<1x4x2x128xf32, #tpu.memory_space<vmem>>, vector<1x1x2x128xf32>
    %22 = vector.shape_cast %21 : vector<1x1x2x128xf32> to vector<2x128xf32>
    %c0_29 = arith.constant 0 : index
    %c2_30 = arith.constant 2 : index
    %23 = arith.index_cast %16 : i32 to index
    %c0_31 = arith.constant 0 : index
    %24 = vector.load %arg4[%c0_29, %c2_30, %23, %c0_31] : memref<1x4x2x128xf32, #tpu.memory_space<vmem>>, vector<1x1x2x128xf32>
    %25 = vector.shape_cast %24 : vector<1x1x2x128xf32> to vector<2x128xf32>
    %c0_32 = arith.constant 0 : index
    %c3_33 = arith.constant 3 : index
    %26 = arith.index_cast %16 : i32 to index
    %c0_34 = arith.constant 0 : index
    %27 = vector.load %arg4[%c0_32, %c3_33, %26, %c0_34] : memref<1x4x2x128xf32, #tpu.memory_space<vmem>>, vector<1x1x2x128xf32>
    %28 = vector.shape_cast %27 : vector<1x1x2x128xf32> to vector<2x128xf32>
    %29 = vector.broadcast %0 : f32 to vector<2x128xf32>
    %30 = arith.mulf %19, %29 : vector<2x128xf32>
    %31 = vector.broadcast %1 : f32 to vector<2x128xf32>
    %32 = arith.mulf %22, %31 : vector<2x128xf32>
    %33 = arith.addf %30, %32 : vector<2x128xf32>
    %34 = vector.broadcast %2 : f32 to vector<2x128xf32>
    %35 = arith.mulf %25, %34 : vector<2x128xf32>
    %36 = arith.addf %33, %35 : vector<2x128xf32>
    %37 = vector.broadcast %3 : f32 to vector<2x128xf32>
    %38 = arith.mulf %28, %37 : vector<2x128xf32>
    %39 = arith.addf %36, %38 : vector<2x128xf32>
    %40 = vector.broadcast %12 : f32 to vector<2x128xf32>
    %41 = arith.addf %39, %40 : vector<2x128xf32>
    %c0_35 = arith.constant 0 : index
    %c0_36 = arith.constant 0 : index
    %42 = arith.index_cast %16 : i32 to index
    %c0_37 = arith.constant 0 : index
    %43 = vector.load %arg5[%c0_35, %c0_36, %42, %c0_37] : memref<1x3x2x128xf32, #tpu.memory_space<vmem>>, vector<1x1x2x128xf32>
    %44 = vector.shape_cast %43 : vector<1x1x2x128xf32> to vector<2x128xf32>
    %45 = vector.shape_cast %41 : vector<2x128xf32> to vector<1x1x2x128xf32>
    tpu.vector_store %arg5[%c0_35, %c0_36, %42, %c0_37], %45 {strides = array<i32>} : memref<1x3x2x128xf32, #tpu.memory_space<vmem>>, vector<1x1x2x128xf32>,
    %46 = vector.broadcast %4 : f32 to vector<2x128xf32>
    %47 = arith.mulf %19, %46 : vector<2x128xf32>
    %48 = vector.broadcast %5 : f32 to vector<2x128xf32>
    %49 = arith.mulf %22, %48 : vector<2x128xf32>
    %50 = arith.addf %47, %49 : vector<2x128xf32>
    %51 = vector.broadcast %6 : f32 to vector<2x128xf32>
    %52 = arith.mulf %25, %51 : vector<2x128xf32>
    %53 = arith.addf %50, %52 : vector<2x128xf32>
    %54 = vector.broadcast %7 : f32 to vector<2x128xf32>
    %55 = arith.mulf %28, %54 : vector<2x128xf32>
    %56 = arith.addf %53, %55 : vector<2x128xf32>
    %57 = vector.broadcast %13 : f32 to vector<2x128xf32>
    %58 = arith.addf %56, %57 : vector<2x128xf32>
    %c0_38 = arith.constant 0 : index
    %c1_39 = arith.constant 1 : index
    %59 = arith.index_cast %16 : i32 to index
    %c0_40 = arith.constant 0 : index
    %60 = vector.load %arg5[%c0_38, %c1_39, %59, %c0_40] : memref<1x3x2x128xf32, #tpu.memory_space<vmem>>, vector<1x1x2x128xf32>
    %61 = vector.shape_cast %60 : vector<1x1x2x128xf32> to vector<2x128xf32>
    %62 = vector.shape_cast %58 : vector<2x128xf32> to vector<1x1x2x128xf32>
    tpu.vector_store %arg5[%c0_38, %c1_39, %59, %c0_40], %62 {strides = array<i32>} : memref<1x3x2x128xf32, #tpu.memory_space<vmem>>, vector<1x1x2x128xf32>,
    %63 = vector.broadcast %8 : f32 to vector<2x128xf32>
    %64 = arith.mulf %19, %63 : vector<2x128xf32>
    %65 = vector.broadcast %9 : f32 to vector<2x128xf32>
    %66 = arith.mulf %22, %65 : vector<2x128xf32>
    %67 = arith.addf %64, %66 : vector<2x128xf32>
    %68 = vector.broadcast %10 : f32 to vector<2x128xf32>
    %69 = arith.mulf %25, %68 : vector<2x128xf32>
    %70 = arith.addf %67, %69 : vector<2x128xf32>
    %71 = vector.broadcast %11 : f32 to vector<2x128xf32>
    %72 = arith.mulf %28, %71 : vector<2x128xf32>
    %73 = arith.addf %70, %72 : vector<2x128xf32>
    %74 = vector.broadcast %14 : f32 to vector<2x128xf32>
    %75 = arith.addf %73, %74 : vector<2x128xf32>
    %c0_41 = arith.constant 0 : index
    %c2_42 = arith.constant 2 : index
    %76 = arith.index_cast %16 : i32 to index
    %c0_43 = arith.constant 0 : index
    %77 = vector.load %arg5[%c0_41, %c2_42, %76, %c0_43] : memref<1x3x2x128xf32, #tpu.memory_space<vmem>>, vector<1x1x2x128xf32>
    %78 = vector.shape_cast %77 : vector<1x1x2x128xf32> to vector<2x128xf32>
    %79 = vector.shape_cast %75 : vector<2x128xf32> to vector<1x1x2x128xf32>
    tpu.vector_store %arg5[%c0_41, %c2_42, %76, %c0_43], %79 {strides = array<i32>} : memref<1x3x2x128xf32, #tpu.memory_space<vmem>>, vector<1x1x2x128xf32>,
    %c1_i32 = arith.constant 1 : i32
    return
  }
  func.func @transform_0(%arg0: i32, %arg1: i32) -> (i32, i32) {
    %c0_i32 = arith.constant 0 : i32
    %c0_i32_0 = arith.constant 0 : i32
    %c0_i32_1 = arith.constant 0 : i32
    return %c0_i32, %c0_i32_0 : i32, i32
  }
  func.func @transform_1(%arg0: i32, %arg1: i32) -> i32 {
    %c0_i32 = arith.constant 0 : i32
    %c0_i32_0 = arith.constant 0 : i32
    return %c0_i32 : i32
  }
  func.func @transform_2(%arg0: i32, %arg1: i32) -> (i32, i32, i32, i32) {
    %c0_i32 = arith.constant 0 : i32
    %c0_i32_0 = arith.constant 0 : i32
    %c0_i32_1 = arith.constant 0 : i32
    return %arg0, %c0_i32, %arg1, %c0_i32_0 : i32, i32, i32, i32
  }
  func.func @transform_3(%arg0: i32, %arg1: i32) -> (i32, i32, i32, i32) {
    %c0_i32 = arith.constant 0 : i32
    %c0_i32_0 = arith.constant 0 : i32
    %c0_i32_1 = arith.constant 0 : i32
    return %arg0, %c0_i32, %arg1, %c0_i32_0 : i32, i32, i32, i32
  }
}

</mosaic_0001>

<bundles_post_ra>
// kernel: tpu_custom_call.1
= control target key start
LH: loop header
LB: loop body
LE: loop exit
PB: predicated region body
PF: predicated region fallthrough
CT: control target
= control target key end

     0   :  { %8 = vsyncpa [#allocation5], 0  ;;  %s966_s0 = inlined_call_operand.hbm [shape: f32[3,4], index: 0, kind: input, shape index: {}]   ;;  %s967_s1 = inlined_call_operand.vmem [shape: f32[3], index: 1, kind: input, shape index: {}]   ;;  %s968_s2 = inlined_call_operand.hbm [shape: f32[2,4,2,128], index: 2, kind: input, shape index: {}]   ;;  %s969_s3 = inlined_call_operand.hbm [shape: f32[2,3,2,128], index: 3, kind: output, shape index: {}]  }
   0x1   :  { %9 = vsyncpa [#allocation6], 0 }
   0x2   :  { %10 = vsyncpa [#allocation3], 0 }
   0x3   :  { %12 = vsyncpa [#allocation3 + $0x1], 0 }
   0x4   :  { %13 = vsyncpa [#allocation4], 0 }
   0x5   :  { %15 = vsyncpa [#allocation4 + $0x1], 0  ;;  %s731_s12 = smov 0   ;;  %s733_s13 = smov 0  }
   0x6   :  { %s735_s14 = smov 0   ;;  %s737_s15 = smov 0  }
   0x7   :  { %s739_s16 = smov 0   ;;  %s741_s17 = smov 0  }
   0x8 LB: > { %s429_s18 = sadd.s32 4294967295, %s701_s17   ;;  %s430_s19 = sadd.s32 4294967294, %s701_s17   ;;  %s701_s17 = sphi %s741_s17, %s21_s17   ;;  %s697_s16 = sphi %s739_s16, %s990_s16   ;;  %s693_s15 = sphi %s737_s15, %s989_s15   ;;  %s689_s14 = sphi %s735_s14, %s988_s14   ;;  %s685_s13 = sphi %s733_s13, %s987_s13   ;;  %s681_s12 = sphi %s731_s12, %s986_s12  }
   0x9   : > { %s84_s20 = sadd.s32 1, %s689_s14  ;;  %p91_p0 = scmp.ne.s32.totalorder %s689_s14, %s685_s13 }
   0xa   : > { %p92_p1 = scmp.eq.s32.totalorder %s701_s17, 0  ;;  %p97_p2 = scmp.ne.s32.totalorder %s685_s13, %s681_s12 }
   0xb   : > { %p769_p3 = scmp.eq.s32.totalorder %s429_s18, 0  ;;  %p123_p4 = scmp.eq.s32.totalorder %s429_s18, 1 }
   0xc   : > { %p93_p5 = por %p92_p1, %p91_p0  ;;  %p129_p6 = scmp.eq.s32.totalorder %s430_s19, 1 }
   0xd   : > { %s974_s21 = scalar_select %p769_p3, 1, 0 }
   0xe   : > { %p775_p7 = por %p769_p3, %p97_p2  ;;  %p779_p8 = por %p123_p4, %p91_p0 }
   0xf   : > { %p783_p9 = por %p129_p6, %p97_p2  ;;  %p431_p10 = scmp.ge.s32.totalorder %s701_s17, 1 }
  0x10   : > { %s975_s22 = scalar_select %p775_p7, 1, 0 }
  0x11   : > { %s976_s23 = scalar_select %p779_p8, 1, 0 }
  0x12   : > { %s977_s24 = scalar_select %p783_p9, 1, 0 }
  0x13   : > { %p136_p11 = scmp.lt.s32.totalorder %s701_s17, 3  ;;  %p495_p1 = scmp.lt.s32.totalorder %s701_s17, 2 }
  0x14   : > { %s158_s28 = sshll.u32 %s967_s1, 4  ;;  %s169_s4 = sand.u32 1, %s689_s14   ;;  %s159_s28 = int_to_ptr.vmem [resolvable:$true] %s158_s28 }
  0x15   : > { %p790_p13 = pnand %p431_p10, %p136_p11  ;;  %p800_p4 = pnand %p495_p1, %p93_p5 }
  0x16   : > { %s33_s5 = sadd.s32 1, %s697_s16  ;;  %s553_s8 = scalar_lea.hbm %s966_s0, 64 }
  0x17   : > { %p478_p0 = pneg %p790_p13  ;;  %p554_p5 = scmp.ne.s32.totalorder %s966_s0, %s553_s8 }
  0x18   : > { %p560_p1 = scmp.lt.u32.totalorder %s553_s8, %s966_s0 }
  0x19   : > { %p806_p2 = pnand %p478_p0, %p769_p3 }
  0x1b   : > { %p555_p6 = pneg %p806_p2 }
  0x1d   : > { %p556_p10 = pnand %p555_p6, %p554_p5 }
  0x1f   : > { %p557_p11 = pneg %p556_p10 }
  0x21   : > { %p562_p0 = pnand %p560_p1, %p557_p11 }
  0x23   : > { %565 = shalt.err (!%p562_p0)
}
  0x24   : > { %s703_s19 = smov [#allocation2]   ;;  %s566_s6 = scalar_lea.vmem %s159_s28, 16 }
  0x25   : > { %481 = dma.hbm_to_smem (!%p806_p2), %s966_s0, 64, %s703_s19, [#allocation5]  }
  0x26   : > { %p567_p12 = scmp.ne.s32.totalorder %s159_s28, %s566_s6  ;;  %p574_p7 = scmp.lt.s32.totalorder %s159_s28, %s159_s28 }
  0x27   : > { %p575_p5 = scmp.lt.s32.totalorder %s566_s6, %s566_s6 }
  0x28   : > { %p569_p9 = pnand %p567_p12, %p555_p6 }
  0x29   : > { %p576_p10 = por %p575_p5, %p574_p7 }
  0x2a   : > { %p570_p8 = pneg %p569_p9 }
  0x2c   : > { %p577_p3 = pnand %p576_p10, %p570_p8 }
  0x2e   : > { %580 = shalt.err (!%p577_p3)
}
  0x2f   : > { %s704_s7 = smov [#allocation7]   ;;  %p35_p11 = scmp.ge.s32.totalorder %s33_s5, 2 }
  0x30   : > { %484 = dma.vmem_to_smem (!%p806_p2), %s159_s28, 16, %s704_s7, [#allocation6]  }
  0x31   : > { %s435_s8 = sshll.u32 %s169_s4, 3  ;;  %s463_s9 = sshll.u32 %s697_s16, 7 }
  0x32   : > { %s992_s5 = smov (%p35_p11, %s33_s5), 0  ;;  %s838_s30 = scalar_lea.hbm %s968_s2, %s463_s9 }
  0x33   : > { %s79_s18 = ssub.s32 %s697_s16, %s992_s5  ;;  %s173_s19 = scalar_lea.vmem [#allocation8], %s435_s8 }
  0x34   : > { %s181_s28 = sshll.u32 %s173_s19, 4  ;;  %p82_p3 = scmp.eq.s32.totalorder %s79_s18, 0  ;;  %s842_s28 = int_to_ptr.vmem [resolvable:$true] %s181_s28 }
  0x35   : > { %s851_s27 = scalar_lea.sflag [#allocation3], %s169_s4  ;;  %s581_s6 = scalar_lea.hbm %s838_s30, 128 }
  0x36   : > { %s847_s26 = scalar_select %p82_p3, %s689_s14, %s84_s20  }
  0x37   : > { %p582_p7 = scmp.ne.s32.totalorder %s838_s30, %s581_s6  ;;  %p583_p8 = pneg %p800_p4 }
  0x38   : > { %s586_s9 = scalar_lea.hbm %s968_s2, 256  ;;  %p587_p2 = scmp.lt.u32.totalorder %s838_s30, %s968_s2 }
  0x39   : > { %p584_p9 = pnand %p583_p8, %p582_p7  ;;  %p588_p6 = scmp.lt.u32.totalorder %s586_s9, %s581_s6 }
  0x3a   : > { %p590_p0 = scmp.lt.u32.totalorder %s581_s6, %s838_s30 }
  0x3b   : > { %p585_p12 = pneg %p584_p9  ;;  %p589_p1 = por %p588_p6, %p587_p2 }
  0x3d   : > { %p591_p5 = por %p590_p0, %p589_p1 }
  0x3f   : > { %p592_p10 = pnand %p591_p5, %p585_p12 }
  0x41   : > { %595 = shalt.err (!%p592_p10)
}
  0x42   : > { %s596_s20 = scalar_lea.vmem %s842_s28, 128  ;;  %s705_s4 = smov [#allocation8]  }
  0x43   : > { %p597_p11 = scmp.ne.s32.totalorder %s842_s28, %s596_s20  ;;  %s601_s18 = sshll.u32 %s705_s4, 4  ;;  %s602_s18 = int_to_ptr.vmem [resolvable:$false] %s601_s18 }
  0x44   : > { %s603_s19 = scalar_lea.vmem %s602_s18, 256  ;;  %p604_p9 = scmp.lt.s32.totalorder %s842_s28, %s602_s18 }
  0x45   : > { %p599_p3 = pnand %p597_p11, %p583_p8  ;;  %p605_p2 = scmp.lt.s32.totalorder %s603_s19, %s596_s20 }
  0x47   : > { %p600_p7 = pneg %p599_p3  ;;  %p606_p6 = por %p605_p2, %p604_p9 }
  0x49   : > { %p607_p1 = pnand %p606_p6, %p600_p7 }
  0x4b   : > { %610 = shalt.err (!%p607_p1)
}
  0x4c   : > { %s706_s6 = smov 32   ;;  %s707_s7 = smov 2  }
  0x4d   : > { %488 = dma.hbm_to_vmem [thread:$0]  (!%p800_p4), %s838_s30, 128, %s842_s28, %s851_s27, %s706_s6, %s706_s6, %s707_s7  }
  0x4e   : > { %193 = sbr.rel (%p790_p13) target bundleno = 131 (0x83), region = 32  ;;  %p981_p8 = scmp.ne.s32.totalorder (!%p790_p13), %s974_s21, 0 }
  0x55   : > { %664 = dma.done.wait (%p981_p8), [#allocation5], 64  }
  0x56   : > { %666 = vsyncadd (%p981_p8), [#allocation5], 4294967232 }
  0x57   : > { %668 = dma.done.wait (%p981_p8), [#allocation6], 16  }
  0x58   : > { %670 = vsyncadd (%p981_p8), [#allocation6], 4294967280  ;;  %s890_s8 = sand.u32 1, %s685_s13   ;;  %p982_p13 = scmp.ne.s32.totalorder %s975_s22, 0 }
  0x59   : > { %s441_s25 = sshll.u32 %s890_s8, 3  ;;  %s204_s29 = scalar_lea.sflag [#allocation3], %s890_s8 }
  0x5a   : > { %s207_s30 = scalar_lea.vmem [#allocation8], %s441_s25 }
  0x5b   : > { %672 = dma.done.wait (%p982_p13), %s204_s29, 128  }
  0x5c   : > { %674 = vsyncadd (%p982_p13), %s204_s29, 4294967168 }
  0x5d   : > { %212 = sfence }
  0x5e   : > { %s231_s28 = sld [smem:[#allocation2]]  ;;  %s442_s27 = sld [smem:[#allocation2 + $0x1]]  ;;  %v246_v0 = vld [vmem:[%s207_s30] sm:$0x3]  ;;  %v455_v1 = vld [vmem:[%s207_s30 + $0x2] sm:$0x3] }
  0x5f   : > { %s443_s9 = sld [smem:[#allocation2 + $0x2]]  ;;  %s444_s21 = sld [smem:[#allocation2 + $0x3]]  ;;  %v456_v2 = vld [vmem:[%s207_s30 + $0x4] sm:$0x3]  ;;  %v457_v4 = vld [vmem:[%s207_s30 + $0x6] sm:$0x3] }
  0x60   : > { %s898_s10 = sld [smem:[#allocation7]]  ;;  %s446_s20 = sld [smem:[#allocation2 + $0x81]] }
  0x61   : > { %s445_s11 = sld [smem:[#allocation2 + $0x80]]  ;;  %s447_s4 = sld [smem:[#allocation2 + $0x82]] }
  0x62   : > { %s448_s18 = sld [smem:[#allocation2 + $0x83]]  ;;  %s449_s22 = sld [smem:[#allocation2 + $0x100]] }
  0x63   : > { %s450_s19 = sld [smem:[#allocation2 + $0x101]]  ;;  %s451_s6 = sld [smem:[#allocation2 + $0x102]] }
  0x64   : > { %v256_v3 = vstv %s231_s28  ;;  %v258_v6 = vstv %s442_s27  ;;  %s900_s7 = sld [smem:[#allocation2 + $0x103]]  ;;  %s902_s25 = sld [smem:[#allocation7 + $0x1]] }
  0x65   : > { %v257_v5 = vmul.f32 %v256_v3, %v246_v0  ;;  %v261_v7 = vstv %s443_s9  ;;  %v259_v8 = vmul.f32 %v455_v1, %v258_v6  ;;  %v264_v10 = vstv %s444_s21  ;;  %s464_s29 = smul.u32 6, %s890_s8  ;;  %s905_s30 = sld [smem:[#allocation7 + $0x2]] }
  0x66   : > { %v262_v9 = vmul.f32 %v456_v2, %v261_v7  ;;  %v265_v12 = vmul.f32 %v457_v4, %v264_v10  ;;  %v272_v15 = vstv %s446_s20  ;;  %v267_v21 = vstv %s898_s10  ;;  %s465_s9 = smul.u32 96, %s693_s15  ;;  %s301_s20 = scalar_lea.sflag [#allocation4], %s890_s8 }
  0x67   : > { %v260_v11 = vadd.f32 %v259_v8, %v257_v5  ;;  %v270_v13 = vstv %s445_s11  ;;  %v275_v16 = vstv %s447_s4  ;;  %v273_v18 = vmul.f32 %v455_v1, %v272_v15  ;;  %s230_s28 = scalar_lea.vmem [#allocation9], %s464_s29  ;;  %p983_p12 = scmp.ne.s32.totalorder %s976_s23, 0 }
  0x68   : > { %v271_v14 = vmul.f32 %v270_v13, %v246_v0  ;;  %v276_v19 = vmul.f32 %v456_v2, %v275_v16  ;;  %v278_v20 = vstv %s448_s18  ;;  %v285_v23 = vstv %s449_s22  ;;  %s315_s27 = sshll.u32 %s230_s28, 4  ;;  %s917_s11 = scalar_lea.hbm %s969_s3, %s465_s9  ;;  %s912_s27 = int_to_ptr.vmem [resolvable:$true] %s315_s27 }
  0x69   : > { %v263_v17 = vadd.f32 %v262_v9, %v260_v11  ;;  %v279_v22 = vmul.f32 %v457_v4, %v278_v20  ;;  %v287_v24 = vstv %s450_s19  ;;  %v286_v27 = vmul.f32 %v285_v23, %v246_v0  ;;  %s611_s4 = scalar_lea.vmem %s912_s27, 96  ;;  %s708_s15 = smov [#allocation9]  }
  0x6a   : > { %v274_v26 = vadd.f32 %v273_v18, %v271_v14  ;;  %v288_v28 = vmul.f32 %v455_v1, %v287_v24  ;;  %v290_v29 = vstv %s451_s6  ;;  %v293_v30 = vstv %s900_s7  ;;  %p612_p4 = scmp.ne.s32.totalorder %s912_s27, %s611_s4  ;;  %s615_s18 = sshll.u32 %s708_s15, 4  ;;  %s616_s18 = int_to_ptr.vmem [resolvable:$false] %s615_s18 }
  0x6b   : > { %v266_v25 = vadd.f32 %v265_v12, %v263_v17  ;;  %v291_v34 = vmul.f32 %v456_v2, %v290_v29  ;;  %v281_v35 = vstv %s902_s25  ;;  %v294_v36 = vmul.f32 %v457_v4, %v293_v30  ;;  %s617_s22 = scalar_lea.vmem %s616_s18, 192  ;;  %p618_p10 = scmp.lt.s32.totalorder %s912_s27, %s616_s18 }
  0x6c   : > { %v277_v32 = vadd.f32 %v276_v19, %v274_v26  ;;  %v289_v33 = vadd.f32 %v288_v28, %v286_v27  ;;  %v296_v39 = vstv %s905_s30  ;;  %p613_p0 = pnand %p612_p4, %p983_p12  ;;  %p619_p11 = scmp.lt.s32.totalorder %s617_s22, %s611_s4 }
  0x6d   : > { %v268_v31 = vadd.f32 %v267_v21, %v266_v25 }
  0x6e   : > { %v280_v37 = vadd.f32 %v279_v22, %v277_v32  ;;  %v292_v38 = vadd.f32 %v291_v34, %v289_v33  ;;  %p614_p5 = pneg %p613_p0  ;;  %p620_p3 = por %p619_p11, %p618_p10 }
  0x6f   : > { %269 = vst [vmem:[%s230_s28] sm:$0x3] %v268_v31 }
  0x70   : > { %v282_v40 = vadd.f32 %v281_v35, %v280_v37  ;;  %v295_v41 = vadd.f32 %v294_v36, %v292_v38  ;;  %p621_p7 = pnand %p620_p3, %p614_p5 }
  0x72   : > { %458 = vst [vmem:[%s230_s28 + $0x2] sm:$0x3] %v282_v40  ;;  %v297_v42 = vadd.f32 %v296_v39, %v295_v41 }
  0x74   : > { %459 = vst [vmem:[%s230_s28 + $0x4] sm:$0x3] %v297_v42 }
  0x75   : > { %624 = shalt.err (!%p621_p7)
}
  0x76   : > { %s625_s19 = scalar_lea.hbm %s917_s11, 96  ;;  %s629_s25 = scalar_lea.hbm %s969_s3, 192 }
  0x77   : > { %p626_p9 = scmp.ne.s32.totalorder %s917_s11, %s625_s19  ;;  %p630_p1 = scmp.lt.u32.totalorder %s917_s11, %s969_s3 }
  0x78   : > { %p631_p8 = scmp.lt.u32.totalorder %s629_s25, %s625_s19  ;;  %p633_p4 = scmp.lt.u32.totalorder %s625_s19, %s917_s11 }
  0x79   : > { %p627_p2 = pnand %p626_p9, %p983_p12 }
  0x7a   : > { %p632_p13 = por %p631_p8, %p630_p1 }
  0x7b   : > { %p628_p6 = pneg %p627_p2 }
  0x7c   : > { %p634_p0 = por %p633_p4, %p632_p13 }
  0x7e   : > { %p635_p5 = pnand %p634_p0, %p628_p6 }
  0x80   : > { %638 = shalt.err (!%p635_p5)
}
  0x81   : > { %s709_s28 = smov 32   ;;  %s710_s9 = smov 2  }
  0x82   : > { %476 = dma.vmem_to_hbm [thread:$0]  (%p983_p12), %s912_s27, 96, %s917_s11, %s301_s20, %s709_s28, %s709_s28, %s710_s9  }
  0x83 PF: > { %s330_s21 = sand.u32 1, %s681_s12   ;;  %p984_p10 = scmp.ne.s32.totalorder %s977_s24, 0 }
  0x84   : > { %p985_p11 = scmp.ge.s32.totalorder %s701_s17, 2  ;;  %s331_s10 = scalar_lea.sflag [#allocation4], %s330_s21 }
  0x86   : > { %p490_p3 = pnand %p985_p11, %p984_p10 }
  0x88   : > { %676 = dma.done.wait (!%p490_p3), %s331_s10, 96  }
  0x89   : > { %678 = vsyncadd (!%p490_p3), %s331_s10, 4294967200  ;;  %s21_s17 = sadd.s32 1, %s701_s17   ;;  %s986_s12 = smov %s685_s13 }
  0x8a   : > { %p18_p7 = scmp.ge.s32.totalorder %s21_s17, 4   ;;  %s987_s13 = smov %s689_s14 }
  0x8b   : > { %s988_s14 = smov %s847_s26  ;;  %s989_s15 = smov %s697_s16 }
  0x8c   : > { %s990_s16 = smov %s992_s5  ;;  %20 = sbr.rel (!%p18_p7) target bundleno = 8 (0x8), region = 92 }
  0x93   :  { %336 = vsyncpa [#allocation3], 1 }
  0x94   :  { %338 = vsyncpa [#allocation3 + $0x1], 1 }
  0x95   :  { %339 = vsyncpa [#allocation4], 1 }
  0x96   :  { %341 = vsyncpa [#allocation4 + $0x1], 1 }
  0x97   :  { %342 = vsyncpa [#allocation5], 1 }
  0x98   :  { %344 = vsyncpa [#allocation5 + $0x1], 1 }
  0x99   :  { %345 = vsyncpa [#allocation6], 1 }
  0x9a   :  { %347 = vsyncpa [#allocation6 + $0x1], 1 }

</bundles_post_ra>
